<compile_context>
chip_gen: v7x
topology: tpu7x:2x2x1
jax: 0.10.0
libtpu: 0.0.40
codegen_flags: <defaults>
</compile_context>

<pallas_src>
import functools

import jax
import jax.numpy as jnp
from jax import lax
from jax.experimental import pallas as pl
from jax.experimental.pallas import tpu as pltpu

_IGNORE_INDEX = -100                    # nn.CrossEntropyLoss default
_NEG_BIG = -1e30                        # mask value for padded class columns


def _round_up(x, m):
    return ((x + m - 1) // m) * m


def _vmem_capacity_bytes():
    """Generation-aware VMEM capacity; conservative 64 MiB (v7x) fallback."""
    try:
        info = pltpu.get_tpu_info()
        for name in ("vmem_capacity_bytes", "vmem_size_bytes", "vmem_bytes"):
            v = getattr(info, name, None)
            if v:
                return int(v)
    except Exception:
        pass
    return 64 * 1024 * 1024


def _divisors(n, unit, cap):
    cap = min(cap, n)
    return [d for d in range(unit, cap + 1, unit) if n % d == 0]


def _pick_tn(c_pad, cap=512):
    ds = _divisors(c_pad, 128, cap)
    pref = [d for d in ds if d % 256 == 0]       # fill 256-wide MXU on v6e/v7x
    return pref[-1] if pref else ds[-1]


def _plan(b_pad, h_pad, c_pad, x_item, w_item, out_item, budget, with_loss):
    """Pick (mode, tm, tn, tk); mode in {'resident', 'tiled'}.

    Footprints conservatively count 2 pipeline buffers per BlockSpec operand.
    """
    slack = 512 * 1024
    extra = (2 * 8 + 4 * 8 * 128 * 4) if with_loss else 0   # labels + partials

    # --- resident weight: full (C_pad, H_pad) weight kept in VMEM -----------
    w_foot = 2 * c_pad * h_pad * w_item
    if w_foot <= budget // 2:
        for tm in reversed(_divisors(b_pad, 8, 512)):
            fp = (w_foot + 2 * tm * h_pad * x_item + 2 * tm * c_pad * out_item
                  + tm * c_pad * 4 + 2 * c_pad * 4 + tm * 8 + extra + slack)
            if fp <= budget:
                return "resident", tm, None, None

    # --- tiled fallback: (i, j, k) grid with f32 K-accumulator --------------
    tn = _pick_tn(c_pad)
    tk = _divisors(h_pad, 128, 1024)[-1]
    for tm in reversed(_divisors(b_pad, 8, 512)):
        fp = (2 * tm * tk * x_item + 2 * tn * tk * w_item
              + 2 * tm * tn * out_item + tm * tn * 4 + 2 * tn * 4
              + tm * 24 + extra + slack)
        if fp <= budget:
            return "tiled", tm, tn, tk
    return "tiled", 8, 128, 128


def _xwT(x, w):
    """x:(m,k) @ w:(n,k)^T -> (m,n) f32; weight stays in nn.Linear layout."""
    return lax.dot_general(x, w, dimension_numbers=(((1,), (1,)), ((), ())),
                           preferred_element_type=jnp.float32)


def _ce_partials(logits, labels, row0, num_rows, num_cols):
    """Cross-entropy partial (sum, count) from FULL rows of f32 logits."""
    tm, cpad = logits.shape
    col = lax.broadcasted_iota(jnp.int32, (tm, cpad), 1)
    masked = jnp.where(col < num_cols, logits, _NEG_BIG)
    m = jnp.max(masked, axis=-1, keepdims=True)
    lse = m + jnp.log(jnp.sum(jnp.exp(masked - m), axis=-1, keepdims=True))
    ll = jnp.sum(jnp.where(col == labels, logits, 0.0), axis=-1, keepdims=True)
    row = row0 + lax.broadcasted_iota(jnp.int32, (tm, 1), 0)
    valid = (row < num_rows) & (labels != _IGNORE_INDEX)
    per_ex = jnp.where(valid, lse - ll, 0.0)
    s = jnp.sum(per_ex, axis=0, keepdims=True)                     # (1, 1)
    c = jnp.sum(valid.astype(jnp.float32), axis=0, keepdims=True)  # (1, 1)
    return s, c


# ---------------------------------------------------------------------------
# Resident-weight kernels (grid over batch tiles only; weight loaded once)
# ---------------------------------------------------------------------------
def _resident_logits_kernel(x_ref, w_ref, b_ref, out_ref):
    acc = _xwT(x_ref[...], w_ref[...]) + b_ref[...]
    out_ref[...] = acc.astype(out_ref.dtype)


def _resident_loss_kernel(x_ref, w_ref, b_ref, lab_ref,
                          logits_ref, lsum_ref, lcnt_ref,
                          *, num_rows, num_cols):
    i = pl.program_id(0)
    logits = _xwT(x_ref[...], w_ref[...]) + b_ref[...]          # (tm, C_pad) f32
    logits_ref[...] = logits.astype(logits_ref.dtype)
    tm = logits.shape[0]
    s, c = _ce_partials(logits, lab_ref[...], i * tm, num_rows, num_cols)
    lsum_ref[...] = jnp.broadcast_to(s, lsum_ref.shape)
    lcnt_ref[...] = jnp.broadcast_to(c, lcnt_ref.shape)


# ---------------------------------------------------------------------------
# Tiled kernels (i, j, k grid; online logsumexp over C tiles)
# ---------------------------------------------------------------------------
def _tiled_logits_kernel(x_ref, w_ref, b_ref, out_ref, acc_ref):
    k = pl.program_id(2)

    @pl.when(k == 0)
    def _():
        acc_ref[...] = jnp.zeros_like(acc_ref)

    acc_ref[...] += _xwT(x_ref[...], w_ref[...])

    @pl.when(k == pl.num_programs(2) - 1)
    def _():
        out_ref[...] = (acc_ref[...] + b_ref[...]).astype(out_ref.dtype)


def _tiled_loss_kernel(x_ref, w_ref, b_ref, lab_ref,
                       logits_ref, lsum_ref, lcnt_ref,
                       acc_ref, m_ref, l_ref, ll_ref,
                       *, num_rows, num_cols):
    i = pl.program_id(0)
    j = pl.program_id(1)
    k = pl.program_id(2)
    nj = pl.num_programs(1)
    nk = pl.num_programs(2)

    @pl.when(k == 0)
    def _():
        acc_ref[...] = jnp.zeros_like(acc_ref)

    @pl.when((j == 0) & (k == 0))
    def _():
        m_ref[...] = jnp.full(m_ref.shape, _NEG_BIG, jnp.float32)
        l_ref[...] = jnp.zeros_like(l_ref)
        ll_ref[...] = jnp.zeros_like(ll_ref)

    acc_ref[...] += _xwT(x_ref[...], w_ref[...])

    @pl.when(k == nk - 1)
    def _():
        logits = acc_ref[...] + b_ref[...]                       # (tm, tn) f32
        logits_ref[...] = logits.astype(logits_ref.dtype)

        tm_, tn_ = logits.shape
        col = j * tn_ + lax.broadcasted_iota(jnp.int32, (tm_, tn_), 1)
        masked = jnp.where(col < num_cols, logits, _NEG_BIG)

        # Online logsumexp update across C tiles.
        m_prev = m_ref[...]
        m_new = jnp.maximum(m_prev, jnp.max(masked, axis=-1, keepdims=True))
        l_ref[...] = (jnp.exp(m_prev - m_new) * l_ref[...]
                      + jnp.sum(jnp.exp(masked - m_new), axis=-1, keepdims=True))
        m_ref[...] = m_new

        labels = lab_ref[...]                                    # (tm, 1) int32
        ll_ref[...] += jnp.sum(jnp.where(col == labels, logits, 0.0),
                               axis=-1, keepdims=True)

        @pl.when(j == nj - 1)
        def _():
            row = i * tm_ + lax.broadcasted_iota(jnp.int32, (tm_, 1), 0)
            valid = (row < num_rows) & (labels != _IGNORE_INDEX)
            per_ex = jnp.where(valid,
                               m_ref[...] + jnp.log(l_ref[...]) - ll_ref[...],
                               0.0)
            s = jnp.sum(per_ex, axis=0, keepdims=True)
            c = jnp.sum(valid.astype(jnp.float32), axis=0, keepdims=True)
            lsum_ref[...] = jnp.broadcast_to(s, lsum_ref.shape)
            lcnt_ref[...] = jnp.broadcast_to(c, lcnt_ref.shape)


# ---------------------------------------------------------------------------
# Wrapper
# ---------------------------------------------------------------------------
def multi_cls_head(hidden_states, weight, bias, labels=None, reduction="mean",
                   *, _force_plan=None):
    """Pallas MultiClsHead.forward: (loss, logits) if labels given, else (logits,)."""
    assert reduction == "mean", "only reduction='mean' implemented"
    B, H = hidden_states.shape
    C, H2 = weight.shape
    assert H == H2
    out_dtype = hidden_states.dtype

    # Layout-minimum padding only (8 sublanes / 128 lanes).
    B_pad = _round_up(B, 8)
    C_pad = _round_up(C, 128)
    H_pad = _round_up(H, 128)

    x = hidden_states
    if (B_pad, H_pad) != (B, H):
        x = jnp.pad(x, ((0, B_pad - B), (0, H_pad - H)))
    w = weight                                    # native (C, H); no transpose
    if (C_pad, H_pad) != (C, H):
        w = jnp.pad(w, ((0, C_pad - C), (0, H_pad - H)))
    b2 = bias.reshape(1, C).astype(jnp.float32)
    if C_pad != C:
        b2 = jnp.pad(b2, ((0, 0), (0, C_pad - C)))

    budget = int(_vmem_capacity_bytes() * 3 // 4)   # ~48 MiB v7x, ~96 MiB v5e/v6e
    plan = _force_plan or _plan(
        B_pad, H_pad, C_pad, x.dtype.itemsize, w.dtype.itemsize,
        jnp.dtype(out_dtype).itemsize, budget, labels is not None)
    mode, tm, tn, tk = plan
    ni = B_pad // tm

    def _cp(sem):
        return pltpu.CompilerParams(dimension_semantics=sem,
                                    vmem_limit_bytes=budget)

    lab = None
    if labels is not None:
        lab = labels.reshape(B, 1).astype(jnp.int32)
        if B_pad != B:
            lab = jnp.pad(lab, ((0, B_pad - B), (0, 0)),
                          constant_values=_IGNORE_INDEX)

    if mode == "resident":
        x_spec = pl.BlockSpec((tm, H_pad), lambda i: (i, 0))
        w_spec = pl.BlockSpec((C_pad, H_pad), lambda i: (0, 0))   # loaded once
        b_spec = pl.BlockSpec((1, C_pad), lambda i: (0, 0))
        o_spec = pl.BlockSpec((tm, C_pad), lambda i: (i, 0))
        if labels is None:
            logits = pl.pallas_call(
                _resident_logits_kernel,
                out_shape=jax.ShapeDtypeStruct((B_pad, C_pad), out_dtype),
                grid_spec=pltpu.PrefetchScalarGridSpec(
                    num_scalar_prefetch=0, grid=(ni,),
                    in_specs=[x_spec, w_spec, b_spec], out_specs=o_spec),
                compiler_params=_cp(("parallel",)),
            )(x, w, b2)
            return (logits[:B, :C],)

        lab_spec = pl.BlockSpec((tm, 1), lambda i: (i, 0))
        p_spec = pl.BlockSpec((1, 8, 128), lambda i: (i, 0, 0))
        kernel = functools.partial(_resident_loss_kernel,
                                   num_rows=B, num_cols=C)
        logits, lsum, lcnt = pl.pallas_call(
            kernel,
            out_shape=(jax.ShapeDtypeStruct((B_pad, C_pad), out_dtype),
                       jax.ShapeDtypeStruct((ni, 8, 128), jnp.float32),
                       jax.ShapeDtypeStruct((ni, 8, 128), jnp.float32)),
            grid_spec=pltpu.PrefetchScalarGridSpec(
                num_scalar_prefetch=0, grid=(ni,),
                in_specs=[x_spec, w_spec, b_spec, lab_spec],
                out_specs=(o_spec, p_spec, p_spec)),
            compiler_params=_cp(("parallel",)),
        )(x, w, b2, lab)
        loss = jnp.sum(lsum[:, 0, 0]) / jnp.sum(lcnt[:, 0, 0])
        return (loss, logits[:B, :C])

    # ------------------------------ tiled path ------------------------------
    grid = (ni, C_pad // tn, H_pad // tk)
    x_spec = pl.BlockSpec((tm, tk), lambda i, j, k: (i, k))
    w_spec = pl.BlockSpec((tn, tk), lambda i, j, k: (j, k))      # (C, H) layout
    b_spec = pl.BlockSpec((1, tn), lambda i, j, k: (0, j))
    o_spec = pl.BlockSpec((tm, tn), lambda i, j, k: (i, j))

    if labels is None:
        logits = pl.pallas_call(
            _tiled_logits_kernel,
            out_shape=jax.ShapeDtypeStruct((B_pad, C_pad), out_dtype),
            grid_spec=pltpu.PrefetchScalarGridSpec(
                num_scalar_prefetch=0, grid=grid,
                in_specs=[x_spec, w_spec, b_spec], out_specs=o_spec,
                scratch_shapes=[pltpu.VMEM((tm, tn), jnp.float32)]),
            compiler_params=_cp(("parallel", "parallel", "arbitrary")),
        )(x, w, b2)
        return (logits[:B, :C],)

    lab_spec = pl.BlockSpec((tm, 1), lambda i, j, k: (i, 0))
    p_spec = pl.BlockSpec((1, 8, 128), lambda i, j, k: (i, 0, 0))
    kernel = functools.partial(_tiled_loss_kernel, num_rows=B, num_cols=C)
    logits, lsum, lcnt = pl.pallas_call(
        kernel,
        out_shape=(jax.ShapeDtypeStruct((B_pad, C_pad), out_dtype),
                   jax.ShapeDtypeStruct((ni, 8, 128), jnp.float32),
                   jax.ShapeDtypeStruct((ni, 8, 128), jnp.float32)),
        grid_spec=pltpu.PrefetchScalarGridSpec(
            num_scalar_prefetch=0, grid=grid,
            in_specs=[x_spec, w_spec, b_spec, lab_spec],
            out_specs=(o_spec, p_spec, p_spec),
            scratch_shapes=[pltpu.VMEM((tm, tn), jnp.float32),   # K accumulator
                            pltpu.VMEM((tm, 1), jnp.float32),    # running max
                            pltpu.VMEM((tm, 1), jnp.float32),    # running sum
                            pltpu.VMEM((tm, 1), jnp.float32)]),  # label logit
        # Per-i partial loss outputs -> batch axis can be megacore-parallel.
        compiler_params=_cp(("parallel", "arbitrary", "arbitrary")),
    )(x, w, b2, lab)
    loss = jnp.sum(lsum[:, 0, 0]) / jnp.sum(lcnt[:, 0, 0])
    return (loss, logits[:B, :C])


# ---------------------------------------------------------------------------
# Pure-JAX reference (ignore_index-aware, like torch CrossEntropyLoss)
# ---------------------------------------------------------------------------
def _reference(hidden_states, weight, bias, labels):
    logits = hidden_states @ weight.T + bias
    lf = logits.astype(jnp.float32)
    lse = jax.scipy.special.logsumexp(lf, axis=-1)
    valid = labels != _IGNORE_INDEX
    safe = jnp.where(valid, labels, 0)
    ll = jnp.take_along_axis(lf, safe[:, None], axis=-1)[:, 0]
    per = jnp.where(valid, lse - ll, 0.0)
    loss = jnp.sum(per) / jnp.sum(valid)
    return loss, logits


if __name__ == "__main__":
    key = jax.random.PRNGKey(0)

    # --- toy shapes consistent with the module (batch=8, hidden=32, cls=8) --
    B, H, C = 8, 32, 8
    k1, k2, k3, k4 = jax.random.split(key, 4)
    x = jax.random.normal(k1, (B, H), jnp.float32)
    bound = 1.0 / (H ** 0.5)
    w = jax.random.uniform(k2, (C, H), jnp.float32, -bound, bound)
    b = jax.random.uniform(k3, (C,), jnp.float32, -bound, bound)
    labels = jax.random.randint(k4, (B,), 0, C, dtype=jnp.int32)

    loss, logits = multi_cls_head(x, w, b, labels)
    jax.block_until_ready((loss, logits))
    ref_loss, ref_logits = _reference(x, w, b, labels)
    assert logits.shape == (B, C)
    assert jnp.allclose(logits, ref_logits, atol=1e-4, rtol=1e-4)
    assert jnp.allclose(loss, ref_loss, atol=1e-4, rtol=1e-4)

    # labels=None path (logits only, no CE epilogue).
    (logits_only,) = multi_cls_head(x, w, b)
    jax.block_until_ready(logits_only)
    assert jnp.allclose(logits_only, ref_logits, atol=1e-4, rtol=1e-4)

    # bf16 streaming path (no f32 upcast of x/w), f32 accumulation.
    xb, wb, bb = (x.astype(jnp.bfloat16), w.astype(jnp.bfloat16),
                  b.astype(jnp.bfloat16))
    loss_bf, logits_bf = multi_cls_head(xb, wb, bb, labels)
    jax.block_until_ready((loss_bf, logits_bf))
    ref_loss_bf, ref_logits_bf = _reference(
        xb.astype(jnp.float32), wb.astype(jnp.float32),
        bb.astype(jnp.float32), labels)
    assert logits_bf.dtype == jnp.bfloat16
    assert jnp.allclose(logits_bf.astype(jnp.float32), ref_logits_bf, atol=6e-2)
    assert jnp.allclose(loss_bf, ref_loss_bf, atol=6e-2)

    # --- larger shapes: default plan is resident-weight (no over-padding) ---
    B2, H2, C2 = 160, 640, 384
    j1, j2, j3, j4 = jax.random.split(jax.random.PRNGKey(1), 4)
    x2 = jax.random.normal(j1, (B2, H2), jnp.float32)
    bound2 = 1.0 / (H2 ** 0.5)
    w2 = jax.random.uniform(j2, (C2, H2), jnp.float32, -bound2, bound2)
    b2 = jax.random.uniform(j3, (C2,), jnp.float32, -bound2, bound2)
    labels2 = jax.random.randint(j4, (B2,), 0, C2, dtype=jnp.int32)
    labels2 = labels2.at[3].set(_IGNORE_INDEX)   # exercise ignore_index

    loss2, logits2 = multi_cls_head(x2, w2, b2, labels2)
    jax.block_until_ready((loss2, logits2))
    ref_loss2, ref_logits2 = _reference(x2, w2, b2, labels2)
    assert logits2.shape == (B2, C2)
    assert jnp.allclose(logits2, ref_logits2, atol=1e-2, rtol=1e-2)
    assert jnp.allclose(loss2, ref_loss2, atol=1e-2, rtol=1e-2)

    # --- force the tiled fallback (multi i/j/k tiles): exercises the online
    #     logsumexp across C tiles, K accumulation, and per-i loss partials ---
    loss3, logits3 = multi_cls_head(x2, w2, b2, labels2,
                                    _force_plan=("tiled", 80, 128, 128))
    jax.block_until_ready((loss3, logits3))
    assert jnp.allclose(logits3, ref_logits2, atol=1e-2, rtol=1e-2)
    assert jnp.allclose(loss3, ref_loss2, atol=1e-2, rtol=1e-2)
    (logits4,) = multi_cls_head(x2, w2, b2,
                                _force_plan=("tiled", 80, 128, 128))
    jax.block_until_ready(logits4)
    assert jnp.allclose(logits4, ref_logits2, atol=1e-2, rtol=1e-2)

    print("KERNEL_OK")
</pallas_src>

<mosaic_0001>
module attributes {stable_mosaic.version = 11 : i64} {
  func.func @_resident_loss_kernel(%arg0: i32, %arg1: memref<8x128xf32, #tpu.memory_space<vmem>>, %arg2: memref<128x128xf32, #tpu.memory_space<vmem>>, %arg3: memref<1x128xf32, #tpu.memory_space<vmem>>, %arg4: memref<8x1xi32, #tpu.memory_space<vmem>>, %arg5: memref<8x128xf32, #tpu.memory_space<vmem>>, %arg6: memref<1x8x128xf32, #tpu.memory_space<vmem>>, %arg7: memref<1x8x128xf32, #tpu.memory_space<vmem>>) attributes {dimension_semantics = [#tpu.dimension_semantics<parallel>], iteration_bounds = array<i64: 1>, scalar_prefetch = 0 : i64, scratch_operands = 0 : i64, tpu.core_type = #tpu.core_type<tc>, window_params = [{transform_indices = @transform_0, window_bounds = array<i64: 8, 128>}, {pipeline_mode = #tpu.pipeline_mode<synchronous>, transform_indices = @transform_1, window_bounds = array<i64: 128, 128>}, {pipeline_mode = #tpu.pipeline_mode<synchronous>, transform_indices = @transform_2, window_bounds = array<i64: 1, 128>}, {transform_indices = @transform_3, window_bounds = array<i64: 8, 1>}, {transform_indices = @transform_4, window_bounds = array<i64: 8, 128>}, {transform_indices = @transform_5, window_bounds = array<i64: 1, 8, 128>}, {transform_indices = @transform_6, window_bounds = array<i64: 1, 8, 128>}]} {
    %c0 = arith.constant 0 : index
    %c0_0 = arith.constant 0 : index
    %0 = vector.load %arg1[%c0, %c0_0] : memref<8x128xf32, #tpu.memory_space<vmem>>, vector<8x128xf32>
    %c0_1 = arith.constant 0 : index
    %c0_2 = arith.constant 0 : index
    %1 = vector.load %arg2[%c0_1, %c0_2] : memref<128x128xf32, #tpu.memory_space<vmem>>, vector<128x128xf32>
    %cst = arith.constant dense<0.000000e+00> : vector<8x128xf32>
    %2 = tpu.matmul %0, %1, %cst {dimension_numbers = #tpu.dot_dimension_numbers<[1], [1], [0], [0], [0, 0, 1, 0], [], []>} : vector<8x128xf32>, vector<128x128xf32>, vector<8x128xf32> -> vector<8x128xf32>
    %c0_3 = arith.constant 0 : index
    %c0_4 = arith.constant 0 : index
    %3 = vector.load %arg3[%c0_3, %c0_4] : memref<1x128xf32, #tpu.memory_space<vmem>>, vector<1x128xf32>
    %4 = vector.broadcast %3 : vector<1x128xf32> to vector<8x128xf32>
    %5 = arith.addf %2, %4 : vector<8x128xf32>
    %c0_5 = arith.constant 0 : index
    %c0_6 = arith.constant 0 : index
    %6 = vector.load %arg5[%c0_5, %c0_6] : memref<8x128xf32, #tpu.memory_space<vmem>>, vector<8x128xf32>
    tpu.vector_store %arg5[%c0_5, %c0_6], %5 {strides = array<i32>} : memref<8x128xf32, #tpu.memory_space<vmem>>, vector<8x128xf32>,
    %c0_7 = arith.constant 0 : index
    %c0_8 = arith.constant 0 : index
    %7 = vector.load %arg4[%c0_7, %c0_8] : memref<8x1xi32, #tpu.memory_space<vmem>>, vector<8x1xi32>
    %c8_i32 = arith.constant 8 : i32
    %8 = arith.muli %arg0, %c8_i32 : i32
    %9 = tpu.iota {dimensions = array<i32: 1>} : vector<8x128xi32>
    %c8_i32_9 = arith.constant 8 : i32
    %10 = vector.broadcast %c8_i32_9 : i32 to vector<8x128xi32>
    %11 = arith.cmpi slt, %9, %10 : vector<8x128xi32>
    %cst_10 = arith.constant -1.000000e+30 : f32
    %12 = vector.broadcast %cst_10 : f32 to vector<8x128xf32>
    %13 = arith.select %11, %5, %12 : vector<8x128xi1>, vector<8x128xf32>
    %cst_11 = arith.constant dense<0xFF800000> : vector<8xf32>
    %14 = vector.multi_reduction <maximumf>, %13, %cst_11 [1] : vector<8x128xf32> to vector<8xf32>
    %15 = vector.shape_cast %14 : vector<8xf32> to vector<8x1xf32>
    %16 = vector.broadcast %15 : vector<8x1xf32> to vector<8x128xf32>
    %17 = arith.subf %13, %16 : vector<8x128xf32>
    %18 = math.exp %17 : vector<8x128xf32>
    %cst_12 = arith.constant dense<0.000000e+00> : vector<8xf32>
    %19 = vector.multi_reduction <add>, %18, %cst_12 [1] : vector<8x128xf32> to vector<8xf32>
    %20 = vector.shape_cast %19 : vector<8xf32> to vector<8x1xf32>
    %21 = math.log %20 : vector<8x1xf32>
    %22 = arith.addf %15, %21 : vector<8x1xf32>
    %23 = vector.broadcast %7 : vector<8x1xi32> to vector<8x128xi32>
    %24 = arith.cmpi eq, %9, %23 : vector<8x128xi32>
    %cst_13 = arith.constant 0.000000e+00 : f32
    %25 = vector.broadcast %cst_13 : f32 to vector<8x128xf32>
    %26 = arith.select %24, %5, %25 : vector<8x128xi1>, vector<8x128xf32>
    %cst_14 = arith.constant dense<0.000000e+00> : vector<8xf32>
    %27 = vector.multi_reduction <add>, %26, %cst_14 [1] : vector<8x128xf32> to vector<8xf32>
    %28 = vector.shape_cast %27 : vector<8xf32> to vector<8x1xf32>
    %29 = tpu.iota {dimensions = array<i32: 0>} : vector<8x1xi32>
    %30 = vector.broadcast %8 : i32 to vector<8x1xi32>
    %31 = arith.addi %30, %29 : vector<8x1xi32>
    %c8_i32_15 = arith.constant 8 : i32
    %32 = vector.broadcast %c8_i32_15 : i32 to vector<8x1xi32>
    %33 = arith.cmpi slt, %31, %32 : vector<8x1xi32>
    %c-100_i32 = arith.constant -100 : i32
    %34 = vector.broadcast %c-100_i32 : i32 to vector<8x1xi32>
    %35 = arith.cmpi ne, %7, %34 : vector<8x1xi32>
    %36 = arith.andi %33, %35 : vector<8x1xi1>
    %37 = arith.subf %22, %28 : vector<8x1xf32>
    %cst_16 = arith.constant 0.000000e+00 : f32
    %38 = vector.broadcast %cst_16 : f32 to vector<8x1xf32>
    %39 = arith.select %36, %37, %38 : vector<8x1xi1>, vector<8x1xf32>
    %cst_17 = arith.constant dense<0.000000e+00> : vector<1xf32>
    %40 = vector.multi_reduction <add>, %39, %cst_17 [0] : vector<8x1xf32> to vector<1xf32>
    %41 = vector.shape_cast %40 : vector<1xf32> to vector<1x1xf32>
    %42 = arith.extui %36 : vector<8x1xi1> to vector<8x1xi32>
    %43 = arith.sitofp %42 : vector<8x1xi32> to vector<8x1xf32>
    %cst_18 = arith.constant dense<0.000000e+00> : vector<1xf32>
    %44 = vector.multi_reduction <add>, %43, %cst_18 [0] : vector<8x1xf32> to vector<1xf32>
    %45 = vector.shape_cast %44 : vector<1xf32> to vector<1x1xf32>
    %46 = vector.shape_cast %41 : vector<1x1xf32> to vector<1x1x1xf32>
    %47 = vector.broadcast %46 : vector<1x1x1xf32> to vector<1x8x128xf32>
    %c0_19 = arith.constant 0 : index
    %c0_20 = arith.constant 0 : index
    %c0_21 = arith.constant 0 : index
    %48 = vector.load %arg6[%c0_19, %c0_20, %c0_21] : memref<1x8x128xf32, #tpu.memory_space<vmem>>, vector<1x8x128xf32>
    tpu.vector_store %arg6[%c0_19, %c0_20, %c0_21], %47 {strides = array<i32>} : memref<1x8x128xf32, #tpu.memory_space<vmem>>, vector<1x8x128xf32>,
    %49 = vector.shape_cast %45 : vector<1x1xf32> to vector<1x1x1xf32>
    %50 = vector.broadcast %49 : vector<1x1x1xf32> to vector<1x8x128xf32>
    %c0_22 = arith.constant 0 : index
    %c0_23 = arith.constant 0 : index
    %c0_24 = arith.constant 0 : index
    %51 = vector.load %arg7[%c0_22, %c0_23, %c0_24] : memref<1x8x128xf32, #tpu.memory_space<vmem>>, vector<1x8x128xf32>
    tpu.vector_store %arg7[%c0_22, %c0_23, %c0_24], %50 {strides = array<i32>} : memref<1x8x128xf32, #tpu.memory_space<vmem>>, vector<1x8x128xf32>,
    return
  }
  func.func @transform_0(%arg0: i32) -> (i32, i32) {
    %c0_i32 = arith.constant 0 : i32
    %c0_i32_0 = arith.constant 0 : i32
    return %arg0, %c0_i32 : i32, i32
  }
  func.func @transform_1(%arg0: i32) -> (i32, i32) {
    %c0_i32 = arith.constant 0 : i32
    %c0_i32_0 = arith.constant 0 : i32
    %c0_i32_1 = arith.constant 0 : i32
    return %c0_i32, %c0_i32_0 : i32, i32
  }
  func.func @transform_2(%arg0: i32) -> (i32, i32) {
    %c0_i32 = arith.constant 0 : i32
    %c0_i32_0 = arith.constant 0 : i32
    %c0_i32_1 = arith.constant 0 : i32
    return %c0_i32, %c0_i32_0 : i32, i32
  }
  func.func @transform_3(%arg0: i32) -> (i32, i32) {
    %c0_i32 = arith.constant 0 : i32
    %c0_i32_0 = arith.constant 0 : i32
    return %arg0, %c0_i32 : i32, i32
  }
  func.func @transform_4(%arg0: i32) -> (i32, i32) {
    %c0_i32 = arith.constant 0 : i32
    %c0_i32_0 = arith.constant 0 : i32
    return %arg0, %c0_i32 : i32, i32
  }
  func.func @transform_5(%arg0: i32) -> (i32, i32, i32) {
    %c0_i32 = arith.constant 0 : i32
    %c0_i32_0 = arith.constant 0 : i32
    %c0_i32_1 = arith.constant 0 : i32
    return %arg0, %c0_i32, %c0_i32_0 : i32, i32, i32
  }
  func.func @transform_6(%arg0: i32) -> (i32, i32, i32) {
    %c0_i32 = arith.constant 0 : i32
    %c0_i32_0 = arith.constant 0 : i32
    %c0_i32_1 = arith.constant 0 : i32
    return %arg0, %c0_i32, %c0_i32_0 : i32, i32, i32
  }
}

</mosaic_0001>

<bundles_post_ra>
// kernel: tpu_custom_call.1
= control target key start
LH: loop header
LB: loop body
LE: loop exit
PB: predicated region body
PF: predicated region fallthrough
CT: control target
= control target key end

     0   :  { %12 = vsyncpa [#allocation3], 0  ;;  %s526_s0 = inlined_call_operand.vmem [shape: f32[8,128], index: 0, kind: input, shape index: {}]   ;;  %s527_s1 = inlined_call_operand.hbm [shape: f32[128,128], index: 1, kind: input, shape index: {}]   ;;  %s528_s2 = inlined_call_operand.vmem [shape: f32[1,128], index: 2, kind: input, shape index: {}]   ;;  %s529_s3 = inlined_call_operand.vmem [shape: s32[8,1], index: 3, kind: input, shape index: {}]   ;;  %s530_s4 = inlined_call_operand.hbm [shape: f32[8,128], index: 4, kind: output, shape index: {0}]   ;;  %s531_s5 = inlined_call_operand.hbm [shape: f32[1,8,128], index: 5, kind: output, shape index: {1}]   ;;  %s532_s6 = inlined_call_operand.hbm [shape: f32[1,8,128], index: 6, kind: output, shape index: {2}]  }
   0x1   :  { %13 = vsyncpa [#allocation4], 0 }
   0x2   :  { %14 = vsyncpa [#allocation7], 0  ;;  %s422_s21 = smov [#allocation2]   ;;  %s328_s25 = scalar_lea.hbm %s527_s1, 2048 }
   0x3   :  { %s22_s22 = sshll.u32 %s422_s21, 4  ;;  %p329_p0 = scmp.ne.s32.totalorder %s527_s1, %s328_s25  ;;  %s23_s22 = int_to_ptr.vmem [resolvable:$true] %s22_s22 }
   0x4   :  { %p332_p1 = scmp.lt.u32.totalorder %s328_s25, %s527_s1 }
   0x6   :  { %p334_p2 = pnand %p332_p1, %p329_p0 }
   0x8   :  { %337 = shalt.err (!%p334_p2)
}
   0x9   :  { %s338_s30 = scalar_lea.vmem %s23_s22, 2048  ;;  %p343_p4 = scmp.lt.s32.totalorder %s23_s22, %s23_s22 }
   0xa   :  { %p339_p3 = scmp.ne.s32.totalorder %s23_s22, %s338_s30  ;;  %p344_p5 = scmp.lt.s32.totalorder %s338_s30, %s338_s30 }
   0xc   :  { %p345_p6 = por %p344_p5, %p343_p4 }
   0xe   :  { %p346_p7 = pnand %p345_p6, %p339_p3 }
  0x10   :  { %349 = shalt.err (!%p346_p7)
}
  0x11   :  { %s423_s7 = smov 128   ;;  %s424_s8 = smov 8  }
  0x12   :  { %28 = dma.hbm_to_vmem [thread:$0]  %s527_s1, 2048, %s23_s22, [#allocation3], %s423_s7, %s423_s7, %s424_s8  }
  0x13   :  { %416 = dma.done.wait [#allocation3], 2048  }
  0x14   :  { %417 = vsyncadd [#allocation3], 4294965248  ;;  %v425_v0 = vmov 0.0|0.0   ;;  %vm426_vm0 = vmmov 0   ;;  %v427_v1 = vmov 0.0   ;;  %v37_v2 = vld [vmem:[#allocation2] sm:$0xff]  ;;  %v133_v28 = vlaneseq }
  0x15   :  { %288 = vmatprep.subr.bf16.mxu0 %v425_v0  ;;  %285 = vmatprep.mubr.msk.f32.mxu0 %vm426_vm0, %v427_v1  ;;  %v38_v3 = vld [vmem:[#allocation2 + $0x8] sm:$0xff]  ;;  %v39_v5 = vld [vmem:[#allocation2 + $0x10] sm:$0xff]  ;;  %v40_v6 = vld [vmem:[#allocation2 + $0x18] sm:$0xff]  ;;  %v428_v27 = vmov 0   ;;  %vm163_vm4 = vcmask 7168  }
  0x16   :  { %v289_v4 = vpack.c.bf16 %v38_v3, %v37_v2  ;;  %v292_v7 = vpack.c.bf16 %v40_v6, %v39_v5  ;;  %v41_v8 = vld [vmem:[#allocation2 + $0x20] sm:$0xff]  ;;  %v42_v9 = vld [vmem:[#allocation2 + $0x28] sm:$0xff]  ;;  %v43_v11 = vld [vmem:[#allocation2 + $0x30] sm:$0xff]  ;;  %322 = vset.pattern.permute.xlu0 %v428_v27  ;;  %323 = vset.pattern.permute.xlu1 %v428_v27  ;;  %v134_v29 = vand.u32 127, %v133_v28 }
  0x17   :  { %v295_v10 = vpack.c.bf16 %v42_v9, %v41_v8  ;;  %v44_v12 = vld [vmem:[#allocation2 + $0x38] sm:$0xff]  ;;  %v45_v14 = vld [vmem:[#allocation2 + $0x40] sm:$0xff]  ;;  %v46_v15 = vld [vmem:[#allocation2 + $0x48] sm:$0xff] }
  0x18   :  { %290 = vmatpush3.bf16.xpose.msra.mxu0 %v289_v4  ;;  %v298_v13 = vpack.c.bf16 %v44_v12, %v43_v11  ;;  %v301_v16 = vpack.c.bf16 %v46_v15, %v45_v14  ;;  %v47_v17 = vld [vmem:[#allocation2 + $0x50] sm:$0xff]  ;;  %v48_v18 = vld [vmem:[#allocation2 + $0x58] sm:$0xff]  ;;  %v49_v20 = vld [vmem:[#allocation2 + $0x60] sm:$0xff]  ;;  %vm135_vm1 = vcmp.lt.s32.totalorder %v134_v29, 8 }
  0x19   :  { %291 = vmatprep.subr.bf16.mxu0 %v425_v0  ;;  %v304_v19 = vpack.c.bf16 %v48_v18, %v47_v17  ;;  %v50_v21 = vld [vmem:[#allocation2 + $0x68] sm:$0xff]  ;;  %v51_v23 = vld [vmem:[#allocation2 + $0x70] sm:$0xff]  ;;  %v52_v24 = vld [vmem:[#allocation2 + $0x78] sm:$0xff] }
  0x1a   :  { %v307_v22 = vpack.c.bf16 %v50_v21, %v49_v20  ;;  %v310_v25 = vpack.c.bf16 %v52_v24, %v51_v23  ;;  %v36_v26 = vld [vmem:[%s526_s0] sm:$0xff]  ;;  %s429_s0 = smov [#allocation5]  }
  0x1b   :  { %v234_v30 = vld [vmem:[%s528_s2] ss:$0 sm:$0xff]  ;;  %s198_s2 = sshll.u32 %s429_s0, 4  ;;  %s199_s2 = int_to_ptr.vmem [resolvable:$true] %s198_s2 }
  0x1c   :  { %v131_v35 = vld [vmem:[%s529_s3] sm:$0xff]  ;;  %s350_s3 = scalar_lea.vmem %s199_s2, 128  ;;  %p355_p9 = scmp.lt.s32.totalorder %s199_s2, %s199_s2 }
  0x1d   :  { %vm159_vm3 = vcmp.ne.s32.totalorder %v131_v35, 4294967196  ;;  %p351_p8 = scmp.ne.s32.totalorder %s199_s2, %s350_s3  ;;  %p356_p10 = scmp.lt.s32.totalorder %s350_s3, %s350_s3 }
  0x1e   :  { %v235_v43 = vsel %vm159_vm3, 1.0, %v427_v1 }
  0x1f   :  { %v173_v44 = vsel %vm163_vm4, %v235_v43, 0.0  ;;  %p357_p11 = por %p356_p10, %p355_p9 }
  0x20   :  { %293 = vmatpush3.bf16.xpose.msra.mxu0 %v292_v7  ;;  %v174_v46 = vrot.slane %v173_v44, 4 }
  0x21   :  { %294 = vmatprep.subr.bf16.mxu0 %v425_v0  ;;  %p358_p12 = pnand %p357_p11, %p351_p8 }
  0x22   :  { %v175_v50 = vadd.f32 %v174_v46, %v173_v44 }
  0x24   :  { %v176_v54 = vrot.slane %v175_v50, 2 }
  0x26   :  { %v177_v57 = vadd.f32 %v176_v54, %v175_v50 }
  0x28   :  { %296 = vmatpush3.bf16.xpose.msra.mxu0 %v295_v10  ;;  %v178_v61 = vrot.slane %v177_v57, 1 }
  0x29   :  { %297 = vmatprep.subr.bf16.mxu0 %v425_v0 }
  0x2a   :  { %v179_v63 = vadd.f32 %v178_v61, %v177_v57 }
  0x30   :  { %299 = vmatpush3.bf16.xpose.msra.mxu0 %v298_v13 }
  0x31   :  { %300 = vmatprep.subr.bf16.mxu0 %v425_v0 }
  0x38   :  { %302 = vmatpush3.bf16.xpose.msra.mxu0 %v301_v16 }
  0x39   :  { %303 = vmatprep.subr.bf16.mxu0 %v425_v0 }
  0x40   :  { %305 = vmatpush3.bf16.xpose.msra.mxu0 %v304_v19 }
  0x41   :  { %306 = vmatprep.subr.bf16.mxu0 %v425_v0 }
  0x48   :  { %308 = vmatpush3.bf16.xpose.msra.mxu0 %v307_v22 }
  0x49   :  { %309 = vmatprep.subr.bf16.mxu0 %v425_v0 }
  0x50   :  { %311 = vmatpush3.bf16.xpose.msra.mxu0 %v310_v25 }
  0x57   :  { %286 = vmatmul.mubr.f32.vlgmr.msra.gmra.mrb[0].mxu0 %v36_v26 }
 0x12a   :  { %v126_v31 = vpop.f32.mrb[0].mxu0 }
 0x12b   :  { %v127_v32 = vadd.f32 %v234_v30, %v126_v31  ;;  %v287_v33 = vpop.f32.mrb[1].mxu0 }
 0x12d   :  { %130 = vst [vmem:[#allocation5] sm:$0xff] %v127_v32  ;;  %v136_v34 = vsel %vm135_vm1, %v127_v32, -1e+30 }
 0x12e   :  { %137 = vmax.xlane.f32.xlu0 %v136_v34 }
 0x144   :  { %148 = vperm.xlu0 %322, %v131_v35  }
 0x1bb   :  { %v138_v36 = vpop.xlane.xlu0 %137 }
 0x1bc   :  { %v139_v37 = vsub.f32 %v136_v34, %v138_v36 }
 0x1be   :  { %v140_v38 = vmul.f32 1.442695, %v139_v37 }
 0x1c0   :  { %324 = vpow2.f32 %v140_v38 }
 0x1c3   :  { %v149_v39 = vpop.permute.xlu0 %148 }
 0x1c4   :  { %vm150_vm2 = vcmp.eq.s32.totalorder %v134_v29, %v149_v39 }
 0x1c5   :  { %v151_v41 = vsel %vm150_vm2, %v127_v32, 0.0 }
 0x1ca   :  { %v325_v40 = vpop.eup %324 }
 0x1cb   :  { %142 = vadd.xlane.f32.xlu1 %v325_v40 }
 0x1cf   :  { %152 = vadd.xlane.f32.xlu1 %v151_v41 }
 0x258   :  { %v143_v42 = vpop.xlane.xlu1 %142 }
 0x259   :  { %326 = vlog2.f32 %v143_v42 }
 0x25c   :  { %v153_v49 = vpop.xlane.xlu1 %152 }
 0x263   :  { %v327_v45 = vpop.eup %326 }
 0x264   :  { %v145_v47 = vmul.f32 0.6931472, %v327_v45 }
 0x266   :  { %v146_v48 = vadd.f32 %v145_v47, %v138_v36 }
 0x268   :  { %v161_v51 = vsub.f32 %v146_v48, %v153_v49 }
 0x26a   :  { %v162_v52 = vsel %vm159_vm3, %v161_v51, 0.0 }
 0x26b   :  { %v164_v53 = vsel %vm163_vm4, %v162_v52, 0.0 }
 0x26c   :  { %v165_v55 = vrot.slane %v164_v53, 4 }
 0x26e   :  { %v166_v56 = vadd.f32 %v165_v55, %v164_v53 }
 0x270   :  { %v167_v58 = vrot.slane %v166_v56, 2 }
 0x272   :  { %v168_v59 = vadd.f32 %v167_v58, %v166_v56 }
 0x274   :  { %v169_v60 = vrot.slane %v168_v59, 1 }
 0x276   :  { %v170_v62 = vadd.f32 %v169_v60, %v168_v59 }
 0x278   :  { %182 = vperm.xlu1 %323, %v170_v62  }
 0x27c   :  { %188 = vperm.xlu1 %323, %v179_v63  }
 0x27d   :  { %361 = shalt.err (!%p358_p12)
}
 0x27e   :  { %s362_s18 = scalar_lea.hbm %s530_s4, 128 }
 0x27f   :  { %p363_p13 = scmp.ne.s32.totalorder %s530_s4, %s362_s18  ;;  %p366_p0 = scmp.lt.u32.totalorder %s362_s18, %s530_s4 }
 0x281   :  { %p368_p1 = pnand %p366_p0, %p363_p13 }
 0x283   :  { %371 = shalt.err (!%p368_p1)
}
 0x284   :  { %201 = dma.vmem_to_hbm [thread:$0]  %s199_s2, 128, %s530_s4, [#allocation4]  }
 0x285   :  { %s430_s25 = smov [#allocation6]   ;;  %s431_s27 = smov [#allocation8]  }
 0x286   :  { %s208_s26 = sshll.u32 %s430_s25, 4  ;;  %s218_s28 = sshll.u32 %s431_s27, 4  ;;  %s209_s26 = int_to_ptr.vmem [resolvable:$true] %s208_s26  ;;  %s219_s28 = int_to_ptr.vmem [resolvable:$true] %s218_s28 }
 0x287   :  { %s372_s29 = scalar_lea.vmem %s209_s26, 128  ;;  %p377_p3 = scmp.lt.s32.totalorder %s209_s26, %s209_s26 }
 0x288   :  { %p373_p2 = scmp.ne.s32.totalorder %s209_s26, %s372_s29  ;;  %p378_p4 = scmp.lt.s32.totalorder %s372_s29, %s372_s29 }
 0x28a   :  { %p379_p5 = por %p378_p4, %p377_p3 }
 0x28c   :  { %p380_p6 = pnand %p379_p5, %p373_p2 }
 0x2f7   :  { %v183_v0 = vpop.permute.xlu1 %182 }
 0x2f8   :  { %185 = vst [vmem:[#allocation6] sm:$0xff] %v183_v0 }
 0x2f9   :  { %383 = shalt.err (!%p380_p6)
}
 0x2fa   :  { %s384_s8 = scalar_lea.hbm %s531_s5, 128 }
 0x2fb   :  { %p385_p7 = scmp.ne.s32.totalorder %s531_s5, %s384_s8  ;;  %p388_p8 = scmp.lt.u32.totalorder %s384_s8, %s531_s5 }
 0x2fd   :  { %p390_p9 = pnand %p388_p8, %p385_p7 }
 0x2ff   :  { %393 = shalt.err (!%p390_p9)
}
 0x300   :  { %211 = dma.vmem_to_hbm [thread:$0]  %s209_s26, 128, %s531_s5, [#allocation7]   ;;  %v189_v1 = vpop.permute.xlu1 %188 }
 0x301   :  { %191 = vst [vmem:[#allocation8] sm:$0xff] %v189_v1  ;;  %s394_s13 = scalar_lea.vmem %s219_s28, 128  ;;  %p399_p11 = scmp.lt.s32.totalorder %s219_s28, %s219_s28 }
 0x302   :  { %p395_p10 = scmp.ne.s32.totalorder %s219_s28, %s394_s13  ;;  %p400_p12 = scmp.lt.s32.totalorder %s394_s13, %s394_s13 }
 0x304   :  { %p401_p13 = por %p400_p12, %p399_p11 }
 0x306   :  { %p402_p0 = pnand %p401_p13, %p395_p10 }
 0x308   :  { %405 = shalt.err (!%p402_p0)
}
 0x309   :  { %s406_s0 = scalar_lea.hbm %s532_s6, 128 }
 0x30a   :  { %p407_p1 = scmp.ne.s32.totalorder %s532_s6, %s406_s0  ;;  %p410_p2 = scmp.lt.u32.totalorder %s406_s0, %s532_s6 }
 0x30c   :  { %p412_p3 = pnand %p410_p2, %p407_p1 }
 0x30e   :  { %415 = shalt.err (!%p412_p3)
}
 0x30f   :  { %221 = dma.vmem_to_hbm [thread:$0]  %s219_s28, 128, %s532_s6, [#allocation7]  }
 0x310   :  { %418 = dma.done.wait [#allocation4], 128  }
 0x311   :  { %419 = vsyncadd [#allocation4], 4294967168 }
 0x312   :  { %420 = dma.done.wait [#allocation7], 256  }
 0x313   :  { %421 = vsyncadd [#allocation7], 4294967040 }
 0x314   :  { %231 = vsyncpa [#allocation3], 1 }
 0x315   :  { %232 = vsyncpa [#allocation4], 1 }
 0x316   :  { %233 = vsyncpa [#allocation7], 1 }

</bundles_post_ra>
